<compile_context>
chip_gen: v5e
topology: v5e:2x2
jax: 0.10.0
libtpu: 0.0.40
codegen_flags: <defaults>
</compile_context>

<pallas_src>
import jax
import jax.numpy as jnp
import numpy as np
from jax.experimental import pallas as pl
from jax.experimental.pallas import tpu as pltpu


# ----------------------------------------------------------------------------
# tile selection: largest lane-dense HW tile that fits a conservative VMEM
# budget once double-buffered.
# ----------------------------------------------------------------------------
def _pick_hw_tile(hw, c_rows, itemsize, budget_bytes=8 * 1024 * 1024):
    for cand in (8192, 4096, 2048, 1024, 512, 256, 128):
        if cand <= hw and hw % cand == 0 and 2 * c_rows * cand * itemsize <= budget_bytes:
            return cand
    # Fallback: full-extent block (legal regardless of divisibility).
    return hw


_COMPILER_PARAMS = pltpu.CompilerParams(
    dimension_semantics=("parallel", "parallel"),
    vmem_limit_bytes=32 * 1024 * 1024,
)


# ----------------------------------------------------------------------------
# 1x1 conv kernel: channel matmul + bias, lane axis = H*W
# ----------------------------------------------------------------------------
def _conv1x1_kernel(x_ref, w_ref, b_ref, o_ref):
    # x_ref: (1, C_in, tHW), w_ref: (C_out, C_in), b_ref: (C_out, 1) f32
    acc = jnp.dot(w_ref[...], x_ref[0], preferred_element_type=jnp.float32)
    o_ref[0] = (acc + b_ref[...]).astype(o_ref.dtype)


def conv1x1_pallas(x_nchw, weight, bias):
    """x_nchw: (N, C_in, H, W); weight: (C_out, C_in); bias: (C_out,)."""
    N, C_in, H, W = x_nchw.shape
    C_out = weight.shape[0]
    HW = H * W

    x3d = x_nchw.reshape(N, C_in, HW)               # contiguous reshape, no copy
    w2d = weight.astype(x_nchw.dtype)               # (C_out, C_in) — bf16-friendly
    b2d = bias.astype(jnp.float32).reshape(C_out, 1)  # f32 bias add (v5e-safe)

    tHW = _pick_hw_tile(HW, C_in + C_out, x_nchw.dtype.itemsize)
    grid = (N, HW // tHW)

    out3d = pl.pallas_call(
        _conv1x1_kernel,
        out_shape=jax.ShapeDtypeStruct((N, C_out, HW), x_nchw.dtype),
        grid_spec=pltpu.PrefetchScalarGridSpec(
            num_scalar_prefetch=0,
            grid=grid,
            in_specs=[
                pl.BlockSpec((1, C_in, tHW), lambda n, h: (n, 0, h)),
                pl.BlockSpec((C_out, C_in), lambda n, h: (0, 0)),
                pl.BlockSpec((C_out, 1), lambda n, h: (0, 0)),
            ],
            out_specs=pl.BlockSpec((1, C_out, tHW), lambda n, h: (n, 0, h)),
        ),
        compiler_params=_COMPILER_PARAMS,
    )(x3d, w2d, b2d)
    # TODO(synk): if Align is ever used with very wide channels (>=128), add a
    # K-reduction grid axis with a VMEM f32 accumulator; irrelevant here.
    return out3d.reshape(N, C_out, H, W)


# ----------------------------------------------------------------------------
# channel-pad kernel: zero-pad channel axis from C_in to C_out
# (writes the copied region and the zero region exactly once each)
# ----------------------------------------------------------------------------
def _pad_kernel(x_ref, o_ref):
    # x_ref: (1, C_in, tHW), o_ref: (1, C_out, tHW)
    c_in = x_ref.shape[1]
    c_out = o_ref.shape[1]
    o_ref[:, :c_in, :] = x_ref[...]
    o_ref[:, c_in:, :] = jnp.zeros((1, c_out - c_in, o_ref.shape[2]), o_ref.dtype)


def channel_pad_pallas(x_nchw, c_out):
    N, C_in, H, W = x_nchw.shape
    HW = H * W
    x3d = x_nchw.reshape(N, C_in, HW)

    tHW = _pick_hw_tile(HW, C_in + c_out, x_nchw.dtype.itemsize)
    grid = (N, HW // tHW)

    out3d = pl.pallas_call(
        _pad_kernel,
        out_shape=jax.ShapeDtypeStruct((N, c_out, HW), x_nchw.dtype),
        grid_spec=pltpu.PrefetchScalarGridSpec(
            num_scalar_prefetch=0,
            grid=grid,
            in_specs=[pl.BlockSpec((1, C_in, tHW), lambda n, h: (n, 0, h))],
            out_specs=pl.BlockSpec((1, c_out, tHW), lambda n, h: (n, 0, h)),
        ),
        compiler_params=_COMPILER_PARAMS,
    )(x3d)
    return out3d.reshape(N, c_out, H, W)


# ----------------------------------------------------------------------------
# Align module wrapper
# ----------------------------------------------------------------------------
class AlignPallas:
    def __init__(self, c_in, c_out, key):
        self.c_in = c_in
        self.c_out = c_out
        self.weight = None
        self.bias = None
        if c_in > c_out:
            # nn.Conv2d(c_in, c_out, 1) default init:
            # kaiming_uniform_(a=sqrt(5)) -> bound = 1/sqrt(fan_in); bias same.
            kw, kb = jax.random.split(key)
            fan_in = c_in  # 1x1 kernel
            bound = 1.0 / np.sqrt(fan_in)
            self.weight = jax.random.uniform(
                kw, (c_out, c_in), jnp.float32, -bound, bound)
            self.bias = jax.random.uniform(
                kb, (c_out,), jnp.float32, -bound, bound)

    def __call__(self, x_nchw):
        if self.c_in > self.c_out:
            return conv1x1_pallas(x_nchw, self.weight, self.bias)
        if self.c_in < self.c_out:
            return channel_pad_pallas(x_nchw, self.c_out)
        return x_nchw


# ----------------------------------------------------------------------------
# main
# ----------------------------------------------------------------------------
if __name__ == "__main__":
    key = jax.random.PRNGKey(0)
    kx, kp = jax.random.split(key)

    ok = True

    # Case 1: c_in > c_out  -> 1x1 conv branch (the hot path)
    N, C_in, C_out, H, W = 2, 8, 4, 16, 16
    x = jax.random.normal(kx, (N, C_in, H, W), jnp.float32)
    align_conv = AlignPallas(C_in, C_out, kp)
    y = jax.block_until_ready(align_conv(x))
    y_ref = jnp.einsum("nchw,oc->nohw", x, align_conv.weight) \
        + align_conv.bias.reshape(1, C_out, 1, 1)
    ok &= bool(np.allclose(np.asarray(y), np.asarray(y_ref), atol=1e-5))
    ok &= (y.shape == (N, C_out, H, W))

    # Case 2: c_in < c_out  -> channel zero-pad branch
    align_pad = AlignPallas(4, 8, kp)
    x2 = jax.random.normal(kx, (2, 4, 16, 16), jnp.float32)
    y2 = jax.block_until_ready(align_pad(x2))
    y2_ref = jnp.pad(x2, ((0, 0), (0, 4), (0, 0), (0, 0)))
    ok &= bool(np.allclose(np.asarray(y2), np.asarray(y2_ref)))

    # Case 3: c_in == c_out -> identity
    align_id = AlignPallas(4, 4, kp)
    y3 = jax.block_until_ready(align_id(x2))
    ok &= bool(np.allclose(np.asarray(y3), np.asarray(x2)))

    if ok:
        print("KERNEL_OK")
</pallas_src>

<mosaic_0001>
module attributes {stable_mosaic.version = 11 : i64} {
  func.func @_conv1x1_kernel(%arg0: i32, %arg1: i32, %arg2: memref<1x8x256xf32, #tpu.memory_space<vmem>>, %arg3: memref<4x8xf32, #tpu.memory_space<vmem>>, %arg4: memref<4x1xf32, #tpu.memory_space<vmem>>, %arg5: memref<1x4x256xf32, #tpu.memory_space<vmem>>) attributes {dimension_semantics = [#tpu.dimension_semantics<parallel>, #tpu.dimension_semantics<parallel>], iteration_bounds = array<i64: 2, 1>, scalar_prefetch = 0 : i64, scratch_operands = 0 : i64, tpu.core_type = #tpu.core_type<tc>, window_params = [{transform_indices = @transform_0, window_bounds = array<i64: 1, 8, 256>}, {pipeline_mode = #tpu.pipeline_mode<synchronous>, transform_indices = @transform_1, window_bounds = array<i64: 4, 8>}, {pipeline_mode = #tpu.pipeline_mode<synchronous>, transform_indices = @transform_2, window_bounds = array<i64: 4, 1>}, {transform_indices = @transform_3, window_bounds = array<i64: 1, 4, 256>}]} {
    %c0 = arith.constant 0 : index
    %c0_0 = arith.constant 0 : index
    %0 = vector.load %arg3[%c0, %c0_0] : memref<4x8xf32, #tpu.memory_space<vmem>>, vector<4x8xf32>
    %c0_1 = arith.constant 0 : index
    %c0_2 = arith.constant 0 : index
    %c0_3 = arith.constant 0 : index
    %1 = vector.load %arg2[%c0_1, %c0_2, %c0_3] : memref<1x8x256xf32, #tpu.memory_space<vmem>>, vector<1x8x256xf32>
    %2 = vector.shape_cast %1 : vector<1x8x256xf32> to vector<8x256xf32>
    %cst = arith.constant dense<0.000000e+00> : vector<4x256xf32>
    %3 = tpu.matmul %0, %2, %cst {dimension_numbers = #tpu.dot_dimension_numbers<[1], [0], [0], [1], [0, 0, 1, 1], [], []>} : vector<4x8xf32>, vector<8x256xf32>, vector<4x256xf32> -> vector<4x256xf32>
    %c0_4 = arith.constant 0 : index
    %c0_5 = arith.constant 0 : index
    %4 = vector.load %arg4[%c0_4, %c0_5] : memref<4x1xf32, #tpu.memory_space<vmem>>, vector<4x1xf32>
    %5 = vector.broadcast %4 : vector<4x1xf32> to vector<4x256xf32>
    %6 = arith.addf %3, %5 : vector<4x256xf32>
    %c0_6 = arith.constant 0 : index
    %c0_7 = arith.constant 0 : index
    %c0_8 = arith.constant 0 : index
    %7 = vector.load %arg5[%c0_6, %c0_7, %c0_8] : memref<1x4x256xf32, #tpu.memory_space<vmem>>, vector<1x4x256xf32>
    %8 = vector.shape_cast %7 : vector<1x4x256xf32> to vector<4x256xf32>
    %9 = vector.shape_cast %6 : vector<4x256xf32> to vector<1x4x256xf32>
    tpu.vector_store %arg5[%c0_6, %c0_7, %c0_8], %9 {strides = array<i32>} : memref<1x4x256xf32, #tpu.memory_space<vmem>>, vector<1x4x256xf32>,
    return
  }
  func.func @transform_0(%arg0: i32, %arg1: i32) -> (i32, i32, i32) {
    %c0_i32 = arith.constant 0 : i32
    %c0_i32_0 = arith.constant 0 : i32
    return %arg0, %c0_i32, %arg1 : i32, i32, i32
  }
  func.func @transform_1(%arg0: i32, %arg1: i32) -> (i32, i32) {
    %c0_i32 = arith.constant 0 : i32
    %c0_i32_0 = arith.constant 0 : i32
    %c0_i32_1 = arith.constant 0 : i32
    return %c0_i32, %c0_i32_0 : i32, i32
  }
  func.func @transform_2(%arg0: i32, %arg1: i32) -> (i32, i32) {
    %c0_i32 = arith.constant 0 : i32
    %c0_i32_0 = arith.constant 0 : i32
    %c0_i32_1 = arith.constant 0 : i32
    return %c0_i32, %c0_i32_0 : i32, i32
  }
  func.func @transform_3(%arg0: i32, %arg1: i32) -> (i32, i32, i32) {
    %c0_i32 = arith.constant 0 : i32
    %c0_i32_0 = arith.constant 0 : i32
    return %arg0, %c0_i32, %arg1 : i32, i32, i32
  }
}

</mosaic_0001>

<bundles_post_ra>
// kernel: tpu_custom_call.1
= control target key start
LH: loop header
LB: loop body
LE: loop exit
PB: predicated region body
PF: predicated region fallthrough
CT: control target
= control target key end

     0   :  { %8 = vsyncpa [#allocation3], 0  ;;  %s717_s0 = inlined_call_operand.hbm [shape: f32[2,8,256], index: 0, kind: input, shape index: {}]   ;;  %s718_s1 = inlined_call_operand.vmem [shape: f32[4,8], index: 1, kind: input, shape index: {}]   ;;  %s719_s2 = inlined_call_operand.vmem [shape: f32[4,1], index: 2, kind: input, shape index: {}]   ;;  %s720_s3 = inlined_call_operand.hbm [shape: f32[2,4,256], index: 3, kind: output, shape index: {}]  }
   0x1   :  { %10 = vsyncpa [#allocation3 + $0x1], 0 }
   0x2   :  { %11 = vsyncpa [#allocation4], 0 }
   0x3   :  { %13 = vsyncpa [#allocation4 + $0x1], 0  ;;  %s590_s12 = smov 0   ;;  %s592_s13 = smov 0  }
   0x4   :  { %s594_s14 = smov 0   ;;  %s596_s15 = smov 0  }
   0x5   :  { %s598_s16 = smov 0   ;;  %s600_s17 = smov 0  }
   0x6 LB: > { %s372_s18 = sadd.s32 4294967295, %s567_s17   ;;  %s373_s19 = sadd.s32 4294967294, %s567_s17   ;;  %s567_s17 = sphi %s600_s17, %s19_s17   ;;  %s563_s16 = sphi %s598_s16, %s729_s16   ;;  %s559_s15 = sphi %s596_s15, %s728_s15   ;;  %s555_s14 = sphi %s594_s14, %s727_s14   ;;  %s551_s13 = sphi %s592_s13, %s726_s13   ;;  %s547_s12 = sphi %s590_s12, %s725_s12  }
   0x7   : > { %s31_s20 = sadd.s32 1, %s563_s16  ;;  %s40_s21 = sadd.s32 1, %s555_s14 }
   0x8   : > { %p33_p0 = scmp.ge.s32.totalorder %s31_s20, 2  ;;  %p47_p1 = scmp.ne.s32.totalorder %s555_s14, %s551_s13 }
   0x9   : > { %p48_p2 = scmp.eq.s32.totalorder %s567_s17, 0  ;;  %p53_p3 = scmp.ne.s32.totalorder %s551_s13, %s547_s12 }
   0xa   : > { %s731_s20 = smov (%p33_p0, %s31_s20), 0  ;;  %p54_p5 = scmp.eq.s32.totalorder %s372_s18, 0 }
   0xb   : > { %p631_p4 = por %p48_p2, %p47_p1  ;;  %s35_s23 = ssub.s32 %s563_s16, %s731_s20 }
   0xc   : > { %p121_p6 = scmp.eq.s32.totalorder %s372_s18, 1  ;;  %p38_p7 = scmp.eq.s32.totalorder %s35_s23, 0 }
   0xd   : > { %p637_p8 = por %p54_p5, %p53_p3  ;;  %p127_p10 = scmp.eq.s32.totalorder %s373_s19, 1 }
   0xe   : > { %p641_p9 = por %p121_p6, %p47_p1  ;;  %p375_p12 = scmp.ge.s32.totalorder %s567_s17, 2 }
   0xf   : > { %s646_s26 = scalar_select %p38_p7, %s555_s14, %s40_s21  }
  0x10   : > { %p648_p11 = por %p127_p10, %p53_p3  ;;  %p403_p13 = scmp.lt.s32.totalorder %s567_s17, 2 }
  0x11   : > { %s153_s28 = sand.u32 1, %s555_s14   ;;  %s389_s30 = sshll.u32 %s563_s16, 4 }
  0x12   : > { %s376_s29 = sshll.u32 %s153_s28, 4  ;;  %s164_s6 = scalar_lea.hbm %s717_s0, %s389_s30 }
  0x13   : > { %s157_s7 = scalar_lea.vmem [#allocation2], %s376_s29  ;;  %s166_s9 = sshll.u32 %s164_s6, 4  ;;  %s167_s9 = int_to_ptr.hbm [resolvable:$true] %s166_s9 }
  0x14   : > { %s168_s8 = sshll.u32 %s157_s7, 4  ;;  %p396_p0 = pnand %p403_p13, %p631_p4  ;;  %s169_s8 = int_to_ptr.vmem [resolvable:$true] %s168_s8 }
  0x15   : > { %p379_p1 = scmp.ge.s32.totalorder %s567_s17, 1  ;;  %p173_p2 = scmp.lt.s32.totalorder %s567_s17, 3 }
  0x16   : > { %s154_s10 = scalar_lea.sflag [#allocation3], %s153_s28 }
  0x17   : > { %398 = dma.hbm_to_vmem [thread:$0]  (!%p396_p0), %s167_s9, 256, %s169_s8, %s154_s10  }
  0x18   : > { %p174_p3 = pnand %p379_p1, %p173_p2 }
  0x19   : > { %s664_s11 = sand.u32 (!%p174_p3), 1, %s551_s13  }
  0x1a   : > { %177 = sbr.rel (%p174_p3) target bundleno = 169 (0xa9), region = 32  ;;  %s380_s18 = sshll.u32 (!%p174_p3), %s664_s11, 4 }
  0x1b   : > { %s180_s19 = scalar_lea.sflag (!%p174_p3), [#allocation3], %s664_s11  ;;  %s183_s21 = scalar_lea.vmem (!%p174_p3), [#allocation2], %s380_s18 }
  0x1f   : > { %538 = dma.done.wait (%p637_p8), %s180_s19, 256  }
  0x20   : > { %540 = vsyncadd (%p637_p8), %s180_s19, 4294967040  ;;  %v569_v0 = vmov 0   ;;  %vm218_vm0 = vcmask 64512   ;;  %v210_v1 = vld [vmem:[%s183_s21] sm:$0xff]  ;;  %v211_v2 = vld [vmem:[%s183_s21 + $0x8] sm:$0xff]  ;;  %s381_s24 = sshll.u32 %s664_s11, 3 }
  0x21   : > { %454 = vset.pattern.permute.xlu0 %v569_v0  ;;  %v209_v3 = vld [vmem:[%s718_s1] sm:$0xf]  ;;  %237 = vmatpush.msra.mxu0 %v210_v1  ;;  %s390_s30 = sshll.u32 %s559_s15, 3  ;;  %s206_s7 = scalar_lea.vmem [#allocation5], %s381_s24  ;;  %vm265_vm1 = vcmask 1043456  }
  0x22   : > { %257 = vmatpush.msra.mxu1 %v211_v2  ;;  %v212_v4 = vld [vmem:[%s719_s2] sm:$0xf]  ;;  %382 = vmatmul.msk.f32.vlgmr.msra.gmra.mxu0 %vm218_vm0, %v209_v3  ;;  %s283_s6 = scalar_lea.hbm %s720_s3, %s390_s30  ;;  %s285_s8 = sshll.u32 %s206_s7, 4  ;;  %s286_s8 = int_to_ptr.vmem [resolvable:$true] %s285_s8 }
  0x23   : > { %383 = vmatmul.msk.f32.vlgmr.msra.gmra.mxu1 %vm218_vm0, %v209_v3  ;;  %215 = vperm.xlu0 %454, %v212_v4   ;;  %s287_s9 = sshll.u32 %s283_s6, 4  ;;  %s270_s15 = scalar_lea.sflag [#allocation4], %s664_s11  ;;  %s288_s9 = int_to_ptr.hbm [resolvable:$true] %s287_s9 }
  0x24   : > { %s499_s10 = sshra.s32 %s288_s9, 4  ;;  %s505_s22 = scalar_lea.hbm %s720_s3, 16  ;;  %s500_s10 = int_to_ptr.hbm [resolvable:$true] %s499_s10 }
  0x25   : > { %s501_s18 = scalar_lea.hbm %s500_s10, 8  ;;  %p506_p7 = scmp.lt.s32.totalorder %s500_s10, %s720_s3 }
  0x26   : > { %p502_p4 = scmp.ne.s32.totalorder %s500_s10, %s501_s18  ;;  %p507_p8 = scmp.lt.s32.totalorder %s505_s22, %s501_s18 }
  0x28   : > { %p503_p5 = pnand %p502_p4, %p641_p9  ;;  %p508_p10 = por %p507_p8, %p506_p7 }
  0x2a   : > { %p504_p6 = pneg %p503_p5 }
  0x2c   : > { %p509_p13 = pnand %p508_p10, %p504_p6 }
  0x95   : > { %v216_v5 = vpop.permute.xlu0 %215 }
  0x9f   : > { %v239_v6 = vpop.f32.mrf.mxu0 }
  0xa0   : > { %v259_v7 = vpop.f32.mrf.mxu1  ;;  %v240_v9 = vadd.f32 %v239_v6, %v216_v5 }
  0xa1   : > { %v260_v8 = vadd.f32 %v259_v7, %v216_v5 }
  0xa3   : > { %v264_v10 = vrot.slane %v260_v8, 4 }
  0xa5   : > { %v266_v11 = vsel %vm265_vm1, %v240_v9, %v264_v10 }
  0xa6   : > { %268 = vst [vmem:[%s206_s7] sm:$0xff] %v266_v11 }
  0xa7   : > { %512 = shalt.err (!%p509_p13)
}
  0xa8   : > { %393 = dma.vmem_to_hbm [thread:$0]  (%p641_p9), %s286_s8, 128, %s288_s9, %s270_s15  }
  0xa9 PF: > { %s299_s11 = sand.u32 1, %s547_s12   ;;  %p400_p0 = pnand %p375_p12, %p648_p11 }
  0xaa   : > { %s300_s29 = scalar_lea.sflag [#allocation4], %s299_s11 }
  0xab   : > { %p401_p1 = pneg %p400_p0 }
  0xad   : > { %542 = dma.done.wait (%p401_p1), %s300_s29, 128  }
  0xae   : > { %544 = vsyncadd (%p401_p1), %s300_s29, 4294967168  ;;  %s19_s17 = sadd.s32 1, %s567_s17   ;;  %s725_s12 = smov %s551_s13 }
  0xaf   : > { %p16_p2 = scmp.ge.s32.totalorder %s19_s17, 4   ;;  %s726_s13 = smov %s555_s14 }
  0xb0   : > { %s727_s14 = smov %s646_s26  ;;  %s728_s15 = smov %s563_s16 }
  0xb1   : > { %s729_s16 = smov %s731_s20  ;;  %18 = sbr.rel (!%p16_p2) target bundleno = 6 (0x6), region = 77 }
  0xb6   :  { %306 = vsyncpa [#allocation3], 1 }
  0xb7   :  { %308 = vsyncpa [#allocation3 + $0x1], 1 }
  0xb8   :  { %309 = vsyncpa [#allocation4], 1 }
  0xb9   :  { %311 = vsyncpa [#allocation4 + $0x1], 1 }

</bundles_post_ra>
